<compile_context>
chip_gen: v6e
topology: v6e:2x2x1
jax: 0.10.0
libtpu: 0.0.40
codegen_flags: <defaults>
</compile_context>

<pallas_src>
import functools

import jax
import jax.numpy as jnp
from jax.experimental import pallas as pl
from jax.experimental.pallas import tpu as pltpu

# ---- config (SimpleNamespace(latent_ndim=NDIM, n_clusters=NCLUSTERS)) ----
NDIM = 4                 # config.latent_ndim
NCLUSTERS = 10           # config.n_clusters
COUT = NDIM * 2
KH = KW = 3
H = W = 7                # input spatial size implied by mlp in_dim = 4*4*ndim*2
OH, OW = H - KH + 1, W - KW + 1        # 5, 5  (after valid 3x3 conv)
PH, PW = OH - 1, OW - 1                # 4, 4  (after AvgPool2d(2, stride=1))
BN_EPS = 1e-5

FIN = H * W * NDIM                     # 196  flattened NHWC input features per sample
FMID = OH * OW * COUT                  # 200  flattened conv/BN/ReLU features per sample
FMID_PAD = 256                         # lane-aligned intermediate width (200 -> 256)
NCL_PAD = 128                          # lane-dense padded logits width (sliced to 10 outside)


def _head_kernel(x_ref, wconv_ref, shift_ref, weff_ref, bias_ref, o_ref):
    # x_ref:     (TB, FIN)            flattened NHWC input slab for one batch tile
    # wconv_ref: (FIN, FMID_PAD)      expanded conv weight (Toeplitz) w/ BN scale, lane-padded
    # shift_ref: (1, FMID_PAD)        folded BN shift per (oh,ow,c) feature, lane-padded
    # weff_ref:  (FMID_PAD, NCL_PAD)  avgpool + flatten + linear folded, lane-padded
    # bias_ref:  (1, NCL_PAD)         linear bias, lane-padded
    # o_ref:     (TB, NCL_PAD)        padded logits
    pre = jnp.dot(x_ref[...], wconv_ref[...], preferred_element_type=jnp.float32)
    act = jnp.maximum(pre + shift_ref[...], 0.0)
    o_ref[...] = (jnp.dot(act, weff_ref[...], preferred_element_type=jnp.float32)
                  + bias_ref[...])


def _build_folded_weights(params):
    """Wrapper-side (plain JAX) weight folds: BN into conv, conv into a dense matrix,
    AvgPool + PyTorch (c,h,w) flatten into the linear weight, lane-pad both output dims."""
    # BatchNorm (eval) fold.
    scale = params["bn_gamma"] / jnp.sqrt(params["bn_var"] + BN_EPS)        # (COUT,)
    shift = params["bn_beta"] - params["bn_mean"] * scale                   # (COUT,)
    wc_scaled = params["conv_w"].astype(jnp.float32) * scale[:, None, None, None]  # (COUT,Cin,KH,KW)

    # Expand the 3x3 valid conv into a dense (FIN, FMID) matrix:
    #   Wexp[ih, iw, ci, oh, ow, co] = wc_scaled[co, ci, ih-oh, iw-ow] for valid taps.
    wexp = jnp.zeros((H, W, NDIM, OH, OW, COUT), jnp.float32)
    for kh in range(KH):
        for kw in range(KW):
            eh = jnp.eye(H, OH, k=-kh, dtype=jnp.float32)                   # ih == oh + kh
            ew = jnp.eye(W, OW, k=-kw, dtype=jnp.float32)                   # iw == ow + kw
            tap = wc_scaled[:, :, kh, kw]                                   # (COUT, Cin)
            wexp = wexp + jnp.einsum("ho,wp,ci->hwiopc", eh, ew, tap)
    wconv2d = wexp.reshape(FIN, FMID)                                       # (196, 200)
    wconv2d_p = jnp.zeros((FIN, FMID_PAD), jnp.float32).at[:, :FMID].set(wconv2d)

    # BN shift replicated over the (oh, ow) positions (channel fastest-varying); padded
    # lanes get 0 so they stay exactly 0 through ReLU and contribute nothing downstream.
    shift_vec = jnp.zeros((1, FMID_PAD), jnp.float32).at[0, :FMID].set(
        jnp.tile(shift.astype(jnp.float32), OH * OW))

    # Fold AvgPool2d(2,1) + PyTorch NCHW flatten into the linear weight:
    #   logits[n] = sum_{c,oh,ow} relu[c,oh,ow] * 0.25 * sum_{dh,dw valid} wl4[n,c,oh-dh,ow-dw]
    wl4 = params["lin_w"].reshape(NCLUSTERS, COUT, PH, PW).astype(jnp.float32)
    weff = jnp.zeros((NCLUSTERS, COUT, OH, OW), jnp.float32)
    for dh in (0, 1):
        for dw in (0, 1):
            weff = weff.at[:, :, dh:dh + PH, dw:dw + PW].add(0.25 * wl4)
    weff = jnp.transpose(weff, (2, 3, 1, 0)).reshape(FMID, NCLUSTERS)       # (200, 10), (oh,ow,c) rows
    weff_p = jnp.zeros((FMID_PAD, NCL_PAD), jnp.float32).at[:FMID, :NCLUSTERS].set(weff)
    bias_p = jnp.zeros((1, NCL_PAD), jnp.float32).at[0, :NCLUSTERS].set(
        params["lin_b"].astype(jnp.float32))
    return wconv2d_p, shift_vec, weff_p, bias_p


@functools.partial(jax.jit, static_argnames=("tb",))
def classification_head(x_nchw, params, tb=1024):
    """x_nchw: (B, NDIM, 7, 7) float32 in PyTorch NCHW layout -> (B, NCLUSTERS) logits."""
    B = x_nchw.shape[0]
    wconv2d_p, shift_vec, weff_p, bias_p = _build_folded_weights(params)

    # NHWC + flatten so the kernel input is a 2-D lane-friendly slab.
    x = jnp.transpose(x_nchw, (0, 2, 3, 1)).reshape(B, FIN).astype(jnp.float32)

    if B <= tb:
        TB, Bp = B, B                      # single batch tile (block dim == full array dim)
    else:
        TB = tb                            # multiple of 8 -> valid sublane tiling
        Bp = ((B + TB - 1) // TB) * TB
        if Bp != B:
            x = jnp.pad(x, ((0, Bp - B), (0, 0)))

    out = pl.pallas_call(
        _head_kernel,
        out_shape=jax.ShapeDtypeStruct((Bp, NCL_PAD), jnp.float32),
        grid_spec=pltpu.PrefetchScalarGridSpec(
            num_scalar_prefetch=0,
            grid=(Bp // TB,),
            in_specs=[
                pl.BlockSpec((TB, FIN), lambda i: (i, 0)),
                pl.BlockSpec((FIN, FMID_PAD), lambda i: (0, 0)),
                pl.BlockSpec((1, FMID_PAD), lambda i: (0, 0)),
                pl.BlockSpec((FMID_PAD, NCL_PAD), lambda i: (0, 0)),
                pl.BlockSpec((1, NCL_PAD), lambda i: (0, 0)),
            ],
            out_specs=pl.BlockSpec((TB, NCL_PAD), lambda i: (i, 0)),
        ),
        compiler_params=pltpu.CompilerParams(dimension_semantics=("parallel",)),
    )(x, wconv2d_p, shift_vec, weff_p, bias_p)
    return out[:B, :NCLUSTERS]


def reference(x_nchw, params):
    """Pure-JAX reference following PyTorch NCHW semantics exactly."""
    hp = jax.lax.Precision.HIGHEST
    y = jax.lax.conv_general_dilated(
        x_nchw, params["conv_w"], window_strides=(1, 1), padding="VALID",
        dimension_numbers=("NCHW", "OIHW", "NCHW"), precision=hp)
    g = params["bn_gamma"][None, :, None, None]
    b = params["bn_beta"][None, :, None, None]
    m = params["bn_mean"][None, :, None, None]
    v = params["bn_var"][None, :, None, None]
    y = (y - m) / jnp.sqrt(v + BN_EPS) * g + b
    y = jnp.maximum(y, 0.0)
    y = 0.25 * (y[:, :, :-1, :-1] + y[:, :, :-1, 1:] + y[:, :, 1:, :-1] + y[:, :, 1:, 1:])
    yf = y.reshape(y.shape[0], -1)                         # NCHW flatten: (c, h, w) order
    return jnp.dot(yf, params["lin_w"].T, precision=hp) + params["lin_b"]


def init_params(key):
    ks = jax.random.split(key, 7)
    in_features = PH * PW * COUT                            # 4 * 4 * ndim * 2
    return {
        "conv_w": 0.2 * jax.random.normal(ks[0], (COUT, NDIM, KH, KW), jnp.float32),
        "bn_gamma": 0.5 + jax.random.uniform(ks[1], (COUT,), jnp.float32),
        "bn_beta": 0.1 * jax.random.normal(ks[2], (COUT,), jnp.float32),
        "bn_mean": 0.1 * jax.random.normal(ks[3], (COUT,), jnp.float32),
        "bn_var": 0.5 + jax.random.uniform(ks[4], (COUT,), jnp.float32),
        "lin_w": 0.1 * jax.random.normal(ks[5], (NCLUSTERS, in_features), jnp.float32),
        "lin_b": 0.1 * jax.random.normal(ks[6], (NCLUSTERS,), jnp.float32),
    }


if __name__ == "__main__":
    key = jax.random.PRNGKey(0)
    kx, kp, kx2 = jax.random.split(key, 3)
    params = init_params(kp)

    # Small deterministic test (B = 2), single batch tile.
    B = 2
    x = jax.random.normal(kx, (B, NDIM, H, W), jnp.float32)     # PyTorch NCHW input
    out = jax.block_until_ready(classification_head(x, params))
    ref = reference(x, params)
    assert out.shape == (B, NCLUSTERS), out.shape
    if not jnp.allclose(out, ref, atol=2e-2, rtol=2e-2):
        raise AssertionError(f"mismatch (B=2): max abs err = {jnp.max(jnp.abs(out - ref))}")

    # Larger batch exercising the multi-tile grid + batch padding path (TB=256, grid=3).
    B2 = 600
    x2 = jax.random.normal(kx2, (B2, NDIM, H, W), jnp.float32)
    out2 = jax.block_until_ready(classification_head(x2, params, tb=256))
    ref2 = reference(x2, params)
    assert out2.shape == (B2, NCLUSTERS), out2.shape
    if not jnp.allclose(out2, ref2, atol=2e-2, rtol=2e-2):
        raise AssertionError(f"mismatch (B=600): max abs err = {jnp.max(jnp.abs(out2 - ref2))}")

    print("KERNEL_OK")
</pallas_src>

<mosaic_0001>
module attributes {stable_mosaic.version = 11 : i64} {
  func.func @_head_kernel(%arg0: i32, %arg1: memref<2x196xf32, #tpu.memory_space<vmem>>, %arg2: memref<196x256xf32, #tpu.memory_space<vmem>>, %arg3: memref<1x256xf32, #tpu.memory_space<vmem>>, %arg4: memref<256x128xf32, #tpu.memory_space<vmem>>, %arg5: memref<1x128xf32, #tpu.memory_space<vmem>>, %arg6: memref<2x128xf32, #tpu.memory_space<vmem>>) attributes {dimension_semantics = [#tpu.dimension_semantics<parallel>], iteration_bounds = array<i64: 1>, scalar_prefetch = 0 : i64, scratch_operands = 0 : i64, tpu.core_type = #tpu.core_type<tc>, window_params = [{transform_indices = @transform_0, window_bounds = array<i64: 2, 196>}, {pipeline_mode = #tpu.pipeline_mode<synchronous>, transform_indices = @transform_1, window_bounds = array<i64: 196, 256>}, {pipeline_mode = #tpu.pipeline_mode<synchronous>, transform_indices = @transform_2, window_bounds = array<i64: 1, 256>}, {pipeline_mode = #tpu.pipeline_mode<synchronous>, transform_indices = @transform_3, window_bounds = array<i64: 256, 128>}, {pipeline_mode = #tpu.pipeline_mode<synchronous>, transform_indices = @transform_4, window_bounds = array<i64: 1, 128>}, {transform_indices = @transform_5, window_bounds = array<i64: 2, 128>}]} {
    %c0 = arith.constant 0 : index
    %c0_0 = arith.constant 0 : index
    %0 = vector.load %arg1[%c0, %c0_0] : memref<2x196xf32, #tpu.memory_space<vmem>>, vector<2x196xf32>
    %c0_1 = arith.constant 0 : index
    %c0_2 = arith.constant 0 : index
    %1 = vector.load %arg2[%c0_1, %c0_2] : memref<196x256xf32, #tpu.memory_space<vmem>>, vector<196x256xf32>
    %cst = arith.constant dense<0.000000e+00> : vector<2x256xf32>
    %2 = tpu.matmul %0, %1, %cst {dimension_numbers = #tpu.dot_dimension_numbers<[1], [0], [0], [1], [0, 0, 1, 1], [], []>} : vector<2x196xf32>, vector<196x256xf32>, vector<2x256xf32> -> vector<2x256xf32>
    %c0_3 = arith.constant 0 : index
    %c0_4 = arith.constant 0 : index
    %3 = vector.load %arg3[%c0_3, %c0_4] : memref<1x256xf32, #tpu.memory_space<vmem>>, vector<1x256xf32>
    %4 = vector.broadcast %3 : vector<1x256xf32> to vector<2x256xf32>
    %5 = arith.addf %2, %4 : vector<2x256xf32>
    %cst_5 = arith.constant 0.000000e+00 : f32
    %6 = vector.broadcast %cst_5 : f32 to vector<2x256xf32>
    %7 = arith.maximumf %5, %6 : vector<2x256xf32>
    %c0_6 = arith.constant 0 : index
    %c0_7 = arith.constant 0 : index
    %8 = vector.load %arg4[%c0_6, %c0_7] : memref<256x128xf32, #tpu.memory_space<vmem>>, vector<256x128xf32>
    %cst_8 = arith.constant dense<0.000000e+00> : vector<2x128xf32>
    %9 = tpu.matmul %7, %8, %cst_8 {dimension_numbers = #tpu.dot_dimension_numbers<[1], [0], [0], [1], [0, 0, 1, 1], [], []>} : vector<2x256xf32>, vector<256x128xf32>, vector<2x128xf32> -> vector<2x128xf32>
    %c0_9 = arith.constant 0 : index
    %c0_10 = arith.constant 0 : index
    %10 = vector.load %arg5[%c0_9, %c0_10] : memref<1x128xf32, #tpu.memory_space<vmem>>, vector<1x128xf32>
    %11 = vector.broadcast %10 : vector<1x128xf32> to vector<2x128xf32>
    %12 = arith.addf %9, %11 : vector<2x128xf32>
    %c0_11 = arith.constant 0 : index
    %c0_12 = arith.constant 0 : index
    %13 = vector.load %arg6[%c0_11, %c0_12] : memref<2x128xf32, #tpu.memory_space<vmem>>, vector<2x128xf32>
    tpu.vector_store %arg6[%c0_11, %c0_12], %12 {strides = array<i32>} : memref<2x128xf32, #tpu.memory_space<vmem>>, vector<2x128xf32>,
    return
  }
  func.func @transform_0(%arg0: i32) -> (i32, i32) {
    %c0_i32 = arith.constant 0 : i32
    %c0_i32_0 = arith.constant 0 : i32
    return %arg0, %c0_i32 : i32, i32
  }
  func.func @transform_1(%arg0: i32) -> (i32, i32) {
    %c0_i32 = arith.constant 0 : i32
    %c0_i32_0 = arith.constant 0 : i32
    %c0_i32_1 = arith.constant 0 : i32
    return %c0_i32, %c0_i32_0 : i32, i32
  }
  func.func @transform_2(%arg0: i32) -> (i32, i32) {
    %c0_i32 = arith.constant 0 : i32
    %c0_i32_0 = arith.constant 0 : i32
    %c0_i32_1 = arith.constant 0 : i32
    return %c0_i32, %c0_i32_0 : i32, i32
  }
  func.func @transform_3(%arg0: i32) -> (i32, i32) {
    %c0_i32 = arith.constant 0 : i32
    %c0_i32_0 = arith.constant 0 : i32
    %c0_i32_1 = arith.constant 0 : i32
    return %c0_i32, %c0_i32_0 : i32, i32
  }
  func.func @transform_4(%arg0: i32) -> (i32, i32) {
    %c0_i32 = arith.constant 0 : i32
    %c0_i32_0 = arith.constant 0 : i32
    %c0_i32_1 = arith.constant 0 : i32
    return %c0_i32, %c0_i32_0 : i32, i32
  }
  func.func @transform_5(%arg0: i32) -> (i32, i32) {
    %c0_i32 = arith.constant 0 : i32
    %c0_i32_0 = arith.constant 0 : i32
    return %arg0, %c0_i32 : i32, i32
  }
}

</mosaic_0001>

<bundles_post_ra>
// kernel: classification_head.1
= control target key start
LH: loop header
LB: loop body
LE: loop exit
PB: predicated region body
PF: predicated region fallthrough
CT: control target
= control target key end

     0   :  { %vm94_vm0 = vcmask 556032   ;;  %s658_s0 = inlined_call_operand.vmem [shape: f32[2,196], index: 0, kind: input, shape index: {}]   ;;  %s659_s1 = inlined_call_operand.vmem [shape: f32[196,256], index: 1, kind: input, shape index: {}]   ;;  %s660_s2 = inlined_call_operand.vmem [shape: f32[1,256], index: 2, kind: input, shape index: {}]   ;;  %s661_s3 = inlined_call_operand.vmem [shape: f32[256,128], index: 3, kind: input, shape index: {}]   ;;  %s662_s4 = inlined_call_operand.vmem [shape: f32[1,128], index: 4, kind: input, shape index: {}]   ;;  %s663_s5 = inlined_call_operand.hbm [shape: f32[2,128], index: 5, kind: output, shape index: {}]  }
   0x1   :  { %v53_v0 = vld [vmem:[%s659_s1 + $0xf8] sm:$0xff]  ;;  %v52_v1 = vld [vmem:[%s659_s1 + $0xf0] sm:$0xff]  ;;  %v51_v2 = vld [vmem:[%s659_s1 + $0xe8] sm:$0xff] }
   0x2   :  { %104 = vmatprep.subr.mxu0 %v53_v0  ;;  %v50_v3 = vld [vmem:[%s659_s1 + $0xe0] sm:$0xff]  ;;  %v49_v4 = vld [vmem:[%s659_s1 + $0xd8] sm:$0xff]  ;;  %v48_v5 = vld [vmem:[%s659_s1 + $0xd0] sm:$0xff] }
   0x3   :  { %105 = vmatpush1.msra.mxu0 %v52_v1  ;;  %v47_v6 = vld [vmem:[%s659_s1 + $0xc8] sm:$0xff]  ;;  %v46_v7 = vld [vmem:[%s659_s1 + $0xc0] sm:$0xff]  ;;  %v45_v8 = vld [vmem:[%s659_s1 + $0xb8] sm:$0xff] }
   0x4   :  { %106 = vmatprep.subr.mxu0 %v51_v2  ;;  %v44_v9 = vld [vmem:[%s659_s1 + $0xb0] sm:$0xff]  ;;  %v43_v10 = vld [vmem:[%s659_s1 + $0xa8] sm:$0xff]  ;;  %v42_v11 = vld [vmem:[%s659_s1 + $0xa0] sm:$0xff] }
   0x5   :  { %107 = vmatpush1.msra.mxu0 %v50_v3  ;;  %v41_v12 = vld [vmem:[%s659_s1 + $0x98] sm:$0xff]  ;;  %v40_v13 = vld [vmem:[%s659_s1 + $0x90] sm:$0xff]  ;;  %v39_v14 = vld [vmem:[%s659_s1 + $0x88] sm:$0xff] }
   0x6   :  { %108 = vmatprep.subr.mxu0 %v49_v4  ;;  %v38_v15 = vld [vmem:[%s659_s1 + $0x80] sm:$0xff]  ;;  %v37_v16 = vld [vmem:[%s659_s1 + $0x78] sm:$0xff]  ;;  %v36_v17 = vld [vmem:[%s659_s1 + $0x70] sm:$0xff] }
   0x7   :  { %109 = vmatpush1.msra.mxu0 %v48_v5  ;;  %v35_v18 = vld [vmem:[%s659_s1 + $0x68] sm:$0xff]  ;;  %v455_v19 = vld.sshfl [vmem:[%s658_s0] sm:$0x33 pattern:$0x76325410]  ;;  %v208_v22 = vld [vmem:[%s661_s3 + $0xf8] sm:$0xff] }
   0x8   :  { %110 = vmatprep.subr.mxu0 %v47_v6  ;;  %v34_v20 = vld [vmem:[%s659_s1 + $0x60] sm:$0xff]  ;;  %v92_v21 = vcombine.high %v455_v19, %v455_v19  ;;  %v192_v23 = vld [vmem:[%s661_s3 + $0x78] sm:$0xff]  ;;  %306 = vmatprep.subr.mxu1 %v208_v22  ;;  %v207_v25 = vld [vmem:[%s661_s3 + $0xf0] sm:$0xff] }
   0x9   :  { %111 = vmatpush1.msra.mxu0 %v46_v7  ;;  %v33_v24 = vld [vmem:[%s659_s1 + $0x58] sm:$0xff]  ;;  %v32_v26 = vld [vmem:[%s659_s1 + $0x50] sm:$0xff]  ;;  %v31_v28 = vld [vmem:[%s659_s1 + $0x48] sm:$0xff]  ;;  %307 = vmatpush3.msra.mxu1 %v192_v23 }
   0xa   :  { %112 = vmatprep.subr.mxu0 %v45_v8  ;;  %304 = vmatprep.mubr.msk.f32.mxu0 %vm94_vm0, %v92_v21  ;;  %v191_v27 = vld [vmem:[%s661_s3 + $0x70] sm:$0xff]  ;;  %v206_v29 = vld [vmem:[%s661_s3 + $0xe8] sm:$0xff]  ;;  %v30_v30 = vld [vmem:[%s659_s1 + $0x40] sm:$0xff] }
   0xb   :  { %113 = vmatpush1.msra.mxu0 %v44_v9  ;;  %308 = vmatprep.subr.mxu1 %v207_v25  ;;  %v190_v31 = vld [vmem:[%s661_s3 + $0x68] sm:$0xff]  ;;  %v29_v32 = vld [vmem:[%s659_s1 + $0x38] sm:$0xff]  ;;  %v205_v33 = vld [vmem:[%s661_s3 + $0xe0] sm:$0xff] }
   0xc   :  { %114 = vmatprep.subr.mxu0 %v43_v10  ;;  %309 = vmatpush3.msra.mxu1 %v191_v27  ;;  %v28_v34 = vld [vmem:[%s659_s1 + $0x30] sm:$0xff]  ;;  %v189_v35 = vld [vmem:[%s661_s3 + $0x60] sm:$0xff]  ;;  %v27_v36 = vld [vmem:[%s659_s1 + $0x28] sm:$0xff] }
   0xd   :  { %115 = vmatpush1.msra.mxu0 %v42_v11  ;;  %310 = vmatprep.subr.mxu1 %v206_v29  ;;  %v204_v37 = vld [vmem:[%s661_s3 + $0xd8] sm:$0xff]  ;;  %v26_v38 = vld [vmem:[%s659_s1 + $0x20] sm:$0xff] }
   0xe   :  { %116 = vmatprep.subr.mxu0 %v41_v12  ;;  %311 = vmatpush3.msra.mxu1 %v190_v31  ;;  %v188_v39 = vld [vmem:[%s661_s3 + $0x58] sm:$0xff] }
   0xf   :  { %117 = vmatpush1.msra.mxu0 %v40_v13  ;;  %312 = vmatprep.subr.mxu1 %v205_v33 }
  0x10   :  { %118 = vmatprep.subr.mxu0 %v39_v14 }
  0x11   :  { %119 = vmatpush1.msra.mxu0 %v38_v15 }
  0x12   :  { %120 = vmatprep.subr.mxu0 %v37_v16 }
  0x13   :  { %121 = vmatpush1.msra.mxu0 %v36_v17 }
  0x14   :  { %122 = vmatprep.subr.mxu0 %v35_v18 }
  0x15   :  { %123 = vmatpush1.msra.mxu0 %v34_v20 }
  0x16   :  { %124 = vmatprep.subr.mxu0 %v33_v24 }
  0x17   :  { %125 = vmatpush1.msra.mxu0 %v32_v26 }
  0x18   :  { %126 = vmatprep.subr.mxu0 %v31_v28 }
  0x19   :  { %127 = vmatpush1.msra.mxu0 %v30_v30 }
  0x1a   :  { %128 = vmatprep.subr.mxu0 %v29_v32 }
  0x1b   :  { %10 = vsyncpa [#allocation3], 0  ;;  %129 = vmatpush1.msra.mxu0 %v28_v34  ;;  %v25_v40 = vld [vmem:[%s659_s1 + $0x18] sm:$0xff]  ;;  %313 = vmatpush3.msra.mxu1 %v189_v35  ;;  %v203_v41 = vld [vmem:[%s661_s3 + $0xd0] sm:$0xff]  ;;  %vm97_vm1 = vcmask 1043456   ;;  %v74_v20 = vlaneseq  ;;  %s364_s6 = smov [#allocation2]  }
  0x1c   :  { %130 = vmatprep.subr.mxu0 %v27_v36  ;;  %v24_v42 = vld [vmem:[%s659_s1 + $0x10] sm:$0xff]  ;;  %314 = vmatprep.subr.mxu1 %v204_v37  ;;  %v23_v44 = vld [vmem:[%s659_s1 + $0x8] sm:$0xff]  ;;  %v22_v46 = vld [vmem:[%s659_s1] sm:$0xff]  ;;  %s293_s7 = sshll.u32 %s364_s6, 4  ;;  %s294_s7 = int_to_ptr.vmem [resolvable:$true] %s293_s7 }
  0x1d   :  { %v187_v43 = vld [vmem:[%s661_s3 + $0x50] sm:$0xff]  ;;  %131 = vmatpush1.msra.mxu0 %v26_v38  ;;  %315 = vmatpush3.msra.mxu1 %v188_v39  ;;  %v202_v45 = vld [vmem:[%s661_s3 + $0xc8] sm:$0xff]  ;;  %v201_v49 = vld [vmem:[%s661_s3 + $0xc0] sm:$0xff]  ;;  %v75_v21 = vshrl.u32 %v74_v20, 7  ;;  %p347_p1 = scmp.lt.s32.totalorder %s294_s7, %s294_s7 }
  0x1e   :  { %132 = vmatprep.subr.mxu0 %v25_v40  ;;  %316 = vmatprep.subr.mxu1 %v203_v41  ;;  %v186_v47 = vld [vmem:[%s661_s3 + $0x48] sm:$0xff]  ;;  %v70_v50 = vld [vmem:[%s659_s1 + $0x180] sm:$0xf]  ;;  %v69_v52 = vld [vmem:[%s659_s1 + $0x178] sm:$0xff] }
  0x1f   :  { %133 = vmatpush1.msra.mxu0 %v24_v42  ;;  %v71_v48 = vld [vmem:[%s659_s1 + $0x188] sm:$0xf]  ;;  %317 = vmatpush3.msra.mxu1 %v187_v43  ;;  %v185_v51 = vld [vmem:[%s661_s3 + $0x40] sm:$0xff]  ;;  %v200_v53 = vld [vmem:[%s661_s3 + $0xb8] sm:$0xff]  ;;  %v76_v22 = vsub.s32 0, %v75_v21  ;;  %v80_v24 = vsub.s32 1, %v75_v21 }
  0x20   :  { %134 = vmatprep.subr.mxu0 %v23_v44  ;;  %318 = vmatprep.subr.mxu1 %v202_v45  ;;  %v68_v54 = vld [vmem:[%s659_s1 + $0x170] sm:$0xff]  ;;  %v184_v55 = vld [vmem:[%s661_s3 + $0x38] sm:$0xff]  ;;  %v67_v56 = vld [vmem:[%s659_s1 + $0x168] sm:$0xff] }
  0x21   :  { %135 = vmatpush1.msra.mxu0 %v22_v46  ;;  %319 = vmatpush3.msra.mxu1 %v186_v47  ;;  %v199_v57 = vld [vmem:[%s661_s3 + $0xb0] sm:$0xff]  ;;  %v66_v58 = vld [vmem:[%s659_s1 + $0x160] sm:$0xff]  ;;  %v65_v60 = vld [vmem:[%s659_s1 + $0x158] sm:$0xff] }
  0x22   :  { %302 = vmatprep.subr.msk.mxu0 %vm97_vm1, %v71_v48  ;;  %320 = vmatprep.subr.mxu1 %v201_v49  ;;  %v183_v59 = vld [vmem:[%s661_s3 + $0x30] sm:$0xff]  ;;  %v198_v61 = vld [vmem:[%s661_s3 + $0xa8] sm:$0xff]  ;;  %v197_v1 = vld [vmem:[%s661_s3 + $0xa0] sm:$0xff] }
  0x23   :  { %303 = vmatpush2.msk.msra.mxu0 %vm97_vm1, %v70_v50  ;;  %321 = vmatpush3.msra.mxu1 %v185_v51  ;;  %v64_v62 = vld [vmem:[%s659_s1 + $0x150] sm:$0xff]  ;;  %v182_v63 = vld [vmem:[%s661_s3 + $0x28] sm:$0xff]  ;;  %v62_v2 = vld [vmem:[%s659_s1 + $0x140] sm:$0xff] }
  0x24   :  { %152 = vmatprep.subr.mxu0 %v69_v52  ;;  %322 = vmatprep.subr.mxu1 %v200_v53  ;;  %v63_v0 = vld [vmem:[%s659_s1 + $0x148] sm:$0xff]  ;;  %v181_v3 = vld [vmem:[%s661_s3 + $0x20] sm:$0xff]  ;;  %v61_v4 = vld [vmem:[%s659_s1 + $0x138] sm:$0xff] }
  0x25   :  { %153 = vmatpush2.msra.mxu0 %v68_v54  ;;  %323 = vmatpush3.msra.mxu1 %v184_v55  ;;  %v60_v5 = vld [vmem:[%s659_s1 + $0x130] sm:$0xff]  ;;  %v59_v6 = vld [vmem:[%s659_s1 + $0x128] sm:$0xff]  ;;  %v58_v7 = vld [vmem:[%s659_s1 + $0x120] sm:$0xff] }
  0x26   :  { %154 = vmatprep.subr.mxu0 %v67_v56  ;;  %324 = vmatprep.subr.mxu1 %v199_v57  ;;  %v57_v8 = vld [vmem:[%s659_s1 + $0x118] sm:$0xff]  ;;  %v56_v9 = vld [vmem:[%s659_s1 + $0x110] sm:$0xff]  ;;  %v55_v10 = vld [vmem:[%s659_s1 + $0x108] sm:$0xff] }
  0x27   :  { %155 = vmatpush2.msra.mxu0 %v66_v58  ;;  %325 = vmatpush3.msra.mxu1 %v183_v59  ;;  %v54_v11 = vld [vmem:[%s659_s1 + $0x100] sm:$0xff]  ;;  %v196_v12 = vld [vmem:[%s661_s3 + $0x98] sm:$0xff]  ;;  %v195_v14 = vld [vmem:[%s661_s3 + $0x90] sm:$0xff] }
  0x28   :  { %156 = vmatprep.subr.mxu0 %v65_v60  ;;  %326 = vmatprep.subr.mxu1 %v198_v61  ;;  %v180_v13 = vld [vmem:[%s661_s3 + $0x18] sm:$0xff]  ;;  %v179_v15 = vld [vmem:[%s661_s3 + $0x10] sm:$0xff]  ;;  %v194_v16 = vld [vmem:[%s661_s3 + $0x88] sm:$0xff] }
  0x29   :  { %157 = vmatpush2.msra.mxu0 %v64_v62  ;;  %327 = vmatpush3.msra.mxu1 %v182_v63  ;;  %v178_v17 = vld [vmem:[%s661_s3 + $0x8] sm:$0xff]  ;;  %v193_v18 = vld [vmem:[%s661_s3 + $0x80] sm:$0xff] }
  0x2a   :  { %158 = vmatprep.subr.mxu0 %v63_v0  ;;  %328 = vmatprep.subr.mxu1 %v197_v1  ;;  %v72_v23 = vld [vmem:[%s660_s2] sm:$0x3]  ;;  %s342_s2 = scalar_lea.vmem %s294_s7, 32 }
  0x2b   :  { %159 = vmatpush2.msra.mxu0 %v62_v2  ;;  %329 = vmatpush3.msra.mxu1 %v181_v3  ;;  %v77_v25 = vrot.slane %v72_v23, %v76_v22  ;;  %v81_v26 = vrot.slane %v72_v23, %v80_v24  ;;  %v305_v35 = vld [vmem:[%s662_s4] ss:$0 sm:$0xff]  ;;  %p343_p0 = scmp.ne.s32.totalorder %s294_s7, %s342_s2  ;;  %p348_p2 = scmp.lt.s32.totalorder %s342_s2, %s342_s2 }
  0x2c   :  { %160 = vmatprep.subr.mxu0 %v61_v4  ;;  %330 = vmatprep.subr.mxu1 %v196_v12 }
  0x2d   :  { %161 = vmatpush2.msra.mxu0 %v60_v5  ;;  %331 = vmatpush3.msra.mxu1 %v180_v13  ;;  %p349_p3 = por %p348_p2, %p347_p1 }
  0x2e   :  { %162 = vmatprep.subr.mxu0 %v59_v6  ;;  %332 = vmatprep.subr.mxu1 %v195_v14 }
  0x2f   :  { %163 = vmatpush2.msra.mxu0 %v58_v7  ;;  %333 = vmatpush3.msra.mxu1 %v179_v15  ;;  %p350_p4 = pnand %p349_p3, %p343_p0 }
  0x30   :  { %164 = vmatprep.subr.mxu0 %v57_v8  ;;  %334 = vmatprep.subr.mxu1 %v194_v16 }
  0x31   :  { %165 = vmatpush2.msra.mxu0 %v56_v9  ;;  %335 = vmatpush3.msra.mxu1 %v178_v17 }
  0x32   :  { %166 = vmatprep.subr.mxu0 %v55_v10  ;;  %336 = vmatprep.subr.mxu1 %v193_v18 }
  0x33   :  { %167 = vmatpush2.msra.mxu0 %v54_v11 }
  0x34   :  { %169 = vmatmul.mubr.f32.vlgmr.msra.gmra.mxu0 %v455_v19  ;;  %v177_v19 = vld [vmem:[%s661_s3] sm:$0xff] }
  0x35   :  { %337 = vmatpush3.msra.mxu1 %v177_v19 }
  0xf4   :  { %v170_v27 = vpop.f32.mrf.mxu0 }
  0xf5   :  { %v171_v28 = vadd.f32 %v170_v27, %v77_v25 }
  0xf6   :  { %v172_v29 = vpop.f32.mrf.mxu0 }
  0xf7   :  { %v173_v30 = vadd.f32 %v172_v29, %v81_v26  ;;  %v175_v32 = vmax.f32 %v171_v28, 0.0 }
  0xf9   :  { %v176_v31 = vmax.f32 %v173_v30, 0.0 }
  0xfb   :  { %280 = vmatprep.mubr.f32.mxu1 %v176_v31 }
  0xfc   :  { %281 = vmatmul.mubr.f32.vlgmr.msra.gmra.mxu1 %v175_v32 }
 0x1bc   :  { %v338_v33 = vpop.f32.mrf.mxu1 }
 0x1be   :  { %v339_v34 = vpop.f32.mrf.mxu1 }
 0x1bf   :  { %v340_v36 = vadd.f32 %v339_v34, %v338_v33 }
 0x1c1   :  { %v283_v37 = vadd.f32 %v340_v36, %v305_v35 }
 0x1c3   :  { %286 = vst [vmem:[#allocation2] sm:$0x3] %v283_v37 }
 0x1c4   :  { %353 = shalt.err (!%p350_p4)
}
 0x1c5   :  { %296 = dma.vmem_to_hbm [thread:$0]  %s294_s7, 32, %s663_s5, [#allocation3]  }
 0x1c6   :  { %362 = dma.done.wait [#allocation3], 32  }
 0x1c7   :  { %363 = vsyncadd [#allocation3], 4294967264 }
 0x1c8   :  { %300 = vsyncpa [#allocation3], 1 }

</bundles_post_ra>
